<compile_context>
chip_gen: v6e
topology: v6e:2x2x1
jax: 0.10.0
libtpu: 0.0.40
codegen_flags: <defaults>
</compile_context>

<pallas_src>
import jax
import jax.numpy as jnp
from jax.experimental import pallas as pl
from jax.experimental.pallas import tpu as pltpu

NEG_SLOPE = 0.01   # nn.LeakyReLU default
_EPS = 1e-5        # BatchNorm2d default eps


def _leaky(v):
    # LeakyReLU for 0 < slope < 1: max(v, s*v)  (mul+max, no cmp/select)
    return jnp.maximum(v, NEG_SLOPE * v)


# ----------------------------------------------------------------------------
# Kernel factory: one grid step = one (C, T) channel-major slab of one image.
# Bias segment offsets are static (closure), so all slices are compile-time.
# ----------------------------------------------------------------------------
def _make_kernel(bias_offsets):
    (o_ta, n_ta), (o_a2, n_a2), (o_att, n_att), (o_c, n_c) = bias_offsets
    C = n_ta // 2

    def kernel(x_ref,                       # (1, C, T)  bf16 input slab
               wta_ref,                     # (2C, C)    stacked trans+aux1 (BN folded)
               wa2_ref,                     # (C/2, C)   aux2 (BN folded)
               watt_ref,                    # (C, C/2)   fused att∘aux3 (BN folded)
               wc_ref,                      # (C, C)     final conv (BN folded)
               b_ref,                       # (ΣCout, 1) packed f32 biases
               o_ref):                      # (1, C, T)  bf16 output slab
        xb = x_ref[0]                                                 # (C, T) bf16

        # One MXU pass over x for both convs that consume it.
        ta = _leaky(jnp.dot(wta_ref[...], xb, preferred_element_type=jnp.float32)
                    + b_ref[o_ta:o_ta + n_ta, :])                     # (2C, T) f32
        feat = ta[:C, :].astype(jnp.bfloat16)                         # trans branch
        a = ta[C:, :].astype(jnp.bfloat16)                            # aux branch

        # aux conv2 + BN + leaky
        a = _leaky(jnp.dot(wa2_ref[...], a, preferred_element_type=jnp.float32)
                   + b_ref[o_a2:o_a2 + n_a2, :]).astype(jnp.bfloat16)  # (C/2, T)

        # fused attention: sigmoid((Watt@Wa3) @ a + fused bias)  -- coarse never
        # materialized (valid only because eval mode does not expose it).
        att = jax.nn.sigmoid(jnp.dot(watt_ref[...], a, preferred_element_type=jnp.float32)
                             + b_ref[o_att:o_att + n_att, :])          # (C, T) f32

        # residual merge (x re-read from VMEM, not held live) + final conv
        merged = (feat * att + x_ref[0]).astype(jnp.bfloat16)
        out = _leaky(jnp.dot(wc_ref[...], merged, preferred_element_type=jnp.float32)
                     + b_ref[o_c:o_c + n_c, :])
        o_ref[0] = out.astype(o_ref.dtype)

    return kernel


# ----------------------------------------------------------------------------
# Wrapper
# ----------------------------------------------------------------------------
def _pick_tile_hw(hw_pad, max_tile=2048):
    """hw_pad is a 128-multiple.  Pick the largest 128-multiple tile dividing it
    while keeping >= 2 HW tiles when possible (megacore-friendly for B == 1)."""
    t = 128
    while t * 2 <= max_tile and hw_pad % (t * 2) == 0 and hw_pad // (t * 2) >= 2:
        t *= 2
    return min(t, hw_pad)


def _const_spec(shape):
    # Constant operand (weights / packed biases): full-array block, fixed index.
    return pl.BlockSpec(shape, lambda b, t, _n=len(shape): (0,) * _n)


def spg_forward(x_nchw, fused):
    """x_nchw: (B, C, H, W) float32 (cast to bf16 for I/O).  fused: fuse_params()."""
    B, C, H, W = x_nchw.shape
    HW = H * W
    HW_pad = -(-HW // 128) * 128            # lane-dense output: pad HW to 128-multiple
    T = _pick_tile_hw(HW_pad)

    x = x_nchw.astype(jnp.bfloat16).reshape(B, C, HW)   # channel-major, no transpose
    if HW_pad != HW:
        x = jnp.pad(x, ((0, 0), (0, 0), (0, HW_pad - HW)))

    weights = [fused["wta"], fused["wa2"], fused["watt"], fused["wc"]]
    b_all = fused["b_all"]
    kernel = _make_kernel(fused["b_offsets"])

    # VMEM budget: 2x double-buffered bf16 activation slabs + constant operands
    # (re-derived from block sizes; clamped at 48 MiB so it is safe on v7x's
    # 64 MiB physical VMEM and still above the 32 MiB default elsewhere).
    act_block_bytes = C * T * 2
    const_bytes = sum(int(w.size) * w.dtype.itemsize for w in weights) \
                  + int(b_all.size) * 4
    need = 4 * act_block_bytes + 2 * const_bytes
    vmem_limit = int(min(48 * 2**20, max(32 * 2**20, 8 * need)))

    out = pl.pallas_call(
        kernel,
        out_shape=jax.ShapeDtypeStruct((B, C, HW_pad), jnp.bfloat16),
        grid=(B, HW_pad // T),
        in_specs=[pl.BlockSpec((1, C, T), lambda b, t: (b, 0, t))]
                 + [_const_spec(w.shape) for w in weights]
                 + [_const_spec(b_all.shape)],
        out_specs=pl.BlockSpec((1, C, T), lambda b, t: (b, 0, t)),
        compiler_params=pltpu.CompilerParams(
            dimension_semantics=("parallel", "parallel"),
            vmem_limit_bytes=vmem_limit),
    )(x, *weights, b_all)

    if HW_pad != HW:
        out = out[:, :, :HW]
    return out.reshape(B, C, H, W)


# ----------------------------------------------------------------------------
# Parameters (synthetic, deterministic) + host-side folding/fusion
# ----------------------------------------------------------------------------
def make_params(key, in_channels, nclass):
    C, C2 = in_channels, in_channels // 2
    ks = iter(jax.random.split(key, 32))

    def conv_w(cout, cin):
        return jax.random.normal(next(ks), (cout, cin), jnp.float32) * (cin ** -0.5)

    def bn_p(c):
        return {
            "gamma": 1.0 + 0.1 * jax.random.normal(next(ks), (c,), jnp.float32),
            "beta": 0.1 * jax.random.normal(next(ks), (c,), jnp.float32),
            "mean": 0.1 * jax.random.normal(next(ks), (c,), jnp.float32),
            "var": jnp.abs(jax.random.normal(next(ks), (c,), jnp.float32)) + 0.5,
        }

    return {
        "trans_w": conv_w(C, C),      "trans_bn": bn_p(C),
        "aux1_w":  conv_w(C, C),      "aux1_bn":  bn_p(C),
        "aux2_w":  conv_w(C2, C),     "aux2_bn":  bn_p(C2),
        "aux3_w":  conv_w(nclass, C2),
        "aux3_b":  0.1 * jax.random.normal(next(ks), (nclass,), jnp.float32),
        "att_w":   conv_w(C, nclass), "att_bn":   bn_p(C),
        "conv_w":  conv_w(C, C),      "conv_bn":  bn_p(C),
    }


def fuse_params(p, eps=_EPS):
    """Host-side folding:
      * BN folded into conv weights (scale into rows) + per-row bias,
      * trans+aux1 stacked into one (2C, C) weight,
      * attention conv folded through aux3 (eval-only fusion),
      * all biases packed into one f32 operand (8-row aligned segments)."""
    def bn_fold(w, bn):
        scale = bn["gamma"] * jax.lax.rsqrt(bn["var"] + eps)
        bias = bn["beta"] - bn["mean"] * scale
        return w * scale[:, None], bias[:, None]

    wt, bt = bn_fold(p["trans_w"], p["trans_bn"])
    wa1, ba1 = bn_fold(p["aux1_w"], p["aux1_bn"])
    wa2, ba2 = bn_fold(p["aux2_w"], p["aux2_bn"])
    watt, batt = bn_fold(p["att_w"], p["att_bn"])
    wc, bc = bn_fold(p["conv_w"], p["conv_bn"])

    # Stack the two convs that consume x.
    wta = jnp.concatenate([wt, wa1], axis=0)            # (2C, C)
    bta = jnp.concatenate([bt, ba1], axis=0)            # (2C, 1)

    # Fold att ∘ aux3 (no nonlinearity between them; coarse never exposed in eval).
    watt_f = watt @ p["aux3_w"]                          # (C, C//2)
    batt_f = watt @ p["aux3_b"][:, None] + batt          # (C, 1)

    # Pack biases into one operand; pad each segment to a multiple of 8 rows so
    # in-kernel slices stay sublane-aligned.
    segs, offsets, off = [], [], 0
    for b in (bta, ba2, batt_f, bc):
        n = b.shape[0]
        n_pad = -(-n // 8) * 8
        segs.append(jnp.pad(b, ((0, n_pad - n), (0, 0))))
        offsets.append((off, n))
        off += n_pad
    b_all = jnp.concatenate(segs, axis=0).astype(jnp.float32)

    return {
        "wta": wta.astype(jnp.bfloat16),
        "wa2": wa2.astype(jnp.bfloat16),
        "watt": watt_f.astype(jnp.bfloat16),
        "wc": wc.astype(jnp.bfloat16),
        "b_all": b_all,
        "b_offsets": tuple(offsets),
    }


# ----------------------------------------------------------------------------
# Pure-JAX f32 reference mirroring the PyTorch eval forward (unfused)
# ----------------------------------------------------------------------------
def spg_reference(x_nchw, p, eps=_EPS):
    B, C, H, W = x_nchw.shape
    x = x_nchw.reshape(B, C, H * W)

    def conv(w, v):
        return jnp.einsum("oi,bip->bop", w, v)

    def bn(v, s):
        scale = s["gamma"] * jax.lax.rsqrt(s["var"] + eps)
        bias = s["beta"] - s["mean"] * scale
        return v * scale[None, :, None] + bias[None, :, None]

    def leaky(v):
        return jnp.where(v >= 0, v, NEG_SLOPE * v)

    feat = leaky(bn(conv(p["trans_w"], x), p["trans_bn"]))
    a = leaky(bn(conv(p["aux1_w"], x), p["aux1_bn"]))
    a = leaky(bn(conv(p["aux2_w"], a), p["aux2_bn"]))
    coarse = conv(p["aux3_w"], a) + p["aux3_b"][None, :, None]
    att = jax.nn.sigmoid(bn(conv(p["att_w"], coarse), p["att_bn"]))
    out = leaky(bn(conv(p["conv_w"], feat * att + x), p["conv_bn"]))
    return out.reshape(B, C, H, W)


if __name__ == "__main__":
    key = jax.random.PRNGKey(0)
    B, C, H, W, NCLASS = 2, 32, 16, 16, 8     # HW = 256 -> two 128-lane tiles/image
    kx, kp = jax.random.split(key)
    x = jax.random.normal(kx, (B, C, H, W), jnp.float32)

    raw = make_params(kp, in_channels=C, nclass=NCLASS)
    fused = fuse_params(raw)

    y = jax.block_until_ready(spg_forward(x, fused))
    y_ref = spg_reference(x, raw)

    assert y.shape == (B, C, H, W)
    yf = y.astype(jnp.float32)
    max_err = jnp.max(jnp.abs(yf - y_ref))
    # bf16 I/O + bf16 matmul operands with f32 accumulation -> few-% error budget.
    assert jnp.allclose(yf, y_ref, atol=6e-2, rtol=6e-2), \
        f"mismatch vs reference (max abs err {max_err})"
    print("KERNEL_OK")
</pallas_src>

<mosaic_0001>
module attributes {stable_mosaic.version = 11 : i64} {
  func.func @kernel(%arg0: i32, %arg1: i32, %arg2: memref<1x32x128xbf16, #tpu.memory_space<vmem>>, %arg3: memref<64x32xbf16, #tpu.memory_space<vmem>>, %arg4: memref<16x32xbf16, #tpu.memory_space<vmem>>, %arg5: memref<32x16xbf16, #tpu.memory_space<vmem>>, %arg6: memref<32x32xbf16, #tpu.memory_space<vmem>>, %arg7: memref<144x1xf32, #tpu.memory_space<vmem>>, %arg8: memref<1x32x128xbf16, #tpu.memory_space<vmem>>) attributes {dimension_semantics = [#tpu.dimension_semantics<parallel>, #tpu.dimension_semantics<parallel>], iteration_bounds = array<i64: 2, 2>, scalar_prefetch = 0 : i64, scratch_operands = 0 : i64, tpu.core_type = #tpu.core_type<tc>, window_params = [{transform_indices = @transform_0, window_bounds = array<i64: 1, 32, 128>}, {pipeline_mode = #tpu.pipeline_mode<synchronous>, transform_indices = @transform_1, window_bounds = array<i64: 64, 32>}, {pipeline_mode = #tpu.pipeline_mode<synchronous>, transform_indices = @transform_2, window_bounds = array<i64: 16, 32>}, {pipeline_mode = #tpu.pipeline_mode<synchronous>, transform_indices = @transform_3, window_bounds = array<i64: 32, 16>}, {pipeline_mode = #tpu.pipeline_mode<synchronous>, transform_indices = @transform_4, window_bounds = array<i64: 32, 32>}, {pipeline_mode = #tpu.pipeline_mode<synchronous>, transform_indices = @transform_5, window_bounds = array<i64: 144, 1>}, {transform_indices = @transform_6, window_bounds = array<i64: 1, 32, 128>}]} {
    %c0 = arith.constant 0 : index
    %c0_0 = arith.constant 0 : index
    %c0_1 = arith.constant 0 : index
    %0 = vector.load %arg2[%c0, %c0_0, %c0_1] : memref<1x32x128xbf16, #tpu.memory_space<vmem>>, vector<1x32x128xbf16>
    %1 = vector.shape_cast %0 : vector<1x32x128xbf16> to vector<32x128xbf16>
    %c0_2 = arith.constant 0 : index
    %c0_3 = arith.constant 0 : index
    %2 = vector.load %arg3[%c0_2, %c0_3] : memref<64x32xbf16, #tpu.memory_space<vmem>>, vector<64x32xbf16>
    %cst = arith.constant dense<0.000000e+00> : vector<64x128xf32>
    %3 = tpu.matmul %2, %1, %cst {dimension_numbers = #tpu.dot_dimension_numbers<[1], [0], [0], [1], [0, 0, 1, 1], [], []>} : vector<64x32xbf16>, vector<32x128xbf16>, vector<64x128xf32> -> vector<64x128xf32>
    %c0_4 = arith.constant 0 : index
    %c0_5 = arith.constant 0 : index
    %4 = vector.load %arg7[%c0_4, %c0_5] : memref<144x1xf32, #tpu.memory_space<vmem>>, vector<64x1xf32>
    %5 = vector.broadcast %4 : vector<64x1xf32> to vector<64x128xf32>
    %6 = arith.addf %3, %5 : vector<64x128xf32>
    %cst_6 = arith.constant 0.00999999977 : f32
    %7 = vector.broadcast %cst_6 : f32 to vector<64x128xf32>
    %8 = arith.mulf %7, %6 : vector<64x128xf32>
    %9 = arith.maximumf %6, %8 : vector<64x128xf32>
    %10 = vector.extract_strided_slice %9 {offsets = [0, 0], sizes = [32, 128], strides = [1, 1]} : vector<64x128xf32> to vector<32x128xf32>
    %11 = arith.truncf %10 : vector<32x128xf32> to vector<32x128xbf16>
    %12 = vector.extract_strided_slice %9 {offsets = [32, 0], sizes = [32, 128], strides = [1, 1]} : vector<64x128xf32> to vector<32x128xf32>
    %13 = arith.truncf %12 : vector<32x128xf32> to vector<32x128xbf16>
    %c0_7 = arith.constant 0 : index
    %c0_8 = arith.constant 0 : index
    %14 = vector.load %arg4[%c0_7, %c0_8] : memref<16x32xbf16, #tpu.memory_space<vmem>>, vector<16x32xbf16>
    %cst_9 = arith.constant dense<0.000000e+00> : vector<16x128xf32>
    %15 = tpu.matmul %14, %13, %cst_9 {dimension_numbers = #tpu.dot_dimension_numbers<[1], [0], [0], [1], [0, 0, 1, 1], [], []>} : vector<16x32xbf16>, vector<32x128xbf16>, vector<16x128xf32> -> vector<16x128xf32>
    %c64 = arith.constant 64 : index
    %c0_10 = arith.constant 0 : index
    %16 = vector.load %arg7[%c64, %c0_10] : memref<144x1xf32, #tpu.memory_space<vmem>>, vector<16x1xf32>
    %17 = vector.broadcast %16 : vector<16x1xf32> to vector<16x128xf32>
    %18 = arith.addf %15, %17 : vector<16x128xf32>
    %cst_11 = arith.constant 0.00999999977 : f32
    %19 = vector.broadcast %cst_11 : f32 to vector<16x128xf32>
    %20 = arith.mulf %19, %18 : vector<16x128xf32>
    %21 = arith.maximumf %18, %20 : vector<16x128xf32>
    %22 = arith.truncf %21 : vector<16x128xf32> to vector<16x128xbf16>
    %c0_12 = arith.constant 0 : index
    %c0_13 = arith.constant 0 : index
    %23 = vector.load %arg5[%c0_12, %c0_13] : memref<32x16xbf16, #tpu.memory_space<vmem>>, vector<32x16xbf16>
    %cst_14 = arith.constant dense<0.000000e+00> : vector<32x128xf32>
    %24 = tpu.matmul %23, %22, %cst_14 {dimension_numbers = #tpu.dot_dimension_numbers<[1], [0], [0], [1], [0, 0, 1, 1], [], []>} : vector<32x16xbf16>, vector<16x128xbf16>, vector<32x128xf32> -> vector<32x128xf32>
    %c80 = arith.constant 80 : index
    %c0_15 = arith.constant 0 : index
    %25 = vector.load %arg7[%c80, %c0_15] : memref<144x1xf32, #tpu.memory_space<vmem>>, vector<32x1xf32>
    %26 = vector.broadcast %25 : vector<32x1xf32> to vector<32x128xf32>
    %27 = arith.addf %24, %26 : vector<32x128xf32>
    %28 = arith.negf %27 : vector<32x128xf32>
    %29 = math.exp %28 : vector<32x128xf32>
    %cst_16 = arith.constant 1.000000e+00 : f32
    %30 = vector.broadcast %cst_16 : f32 to vector<32x128xf32>
    %31 = arith.addf %30, %29 : vector<32x128xf32>
    %32 = arith.divf %30, %31 : vector<32x128xf32>
    %33 = arith.extf %11 : vector<32x128xbf16> to vector<32x128xf32>
    %34 = arith.mulf %33, %32 : vector<32x128xf32>
    %c0_17 = arith.constant 0 : index
    %c0_18 = arith.constant 0 : index
    %c0_19 = arith.constant 0 : index
    %35 = vector.load %arg2[%c0_17, %c0_18, %c0_19] : memref<1x32x128xbf16, #tpu.memory_space<vmem>>, vector<1x32x128xbf16>
    %36 = vector.shape_cast %35 : vector<1x32x128xbf16> to vector<32x128xbf16>
    %37 = arith.extf %36 : vector<32x128xbf16> to vector<32x128xf32>
    %38 = arith.addf %34, %37 : vector<32x128xf32>
    %39 = arith.truncf %38 : vector<32x128xf32> to vector<32x128xbf16>
    %c0_20 = arith.constant 0 : index
    %c0_21 = arith.constant 0 : index
    %40 = vector.load %arg6[%c0_20, %c0_21] : memref<32x32xbf16, #tpu.memory_space<vmem>>, vector<32x32xbf16>
    %cst_22 = arith.constant dense<0.000000e+00> : vector<32x128xf32>
    %41 = tpu.matmul %40, %39, %cst_22 {dimension_numbers = #tpu.dot_dimension_numbers<[1], [0], [0], [1], [0, 0, 1, 1], [], []>} : vector<32x32xbf16>, vector<32x128xbf16>, vector<32x128xf32> -> vector<32x128xf32>
    %c112 = arith.constant 112 : index
    %c0_23 = arith.constant 0 : index
    %42 = vector.load %arg7[%c112, %c0_23] : memref<144x1xf32, #tpu.memory_space<vmem>>, vector<32x1xf32>
    %43 = vector.broadcast %42 : vector<32x1xf32> to vector<32x128xf32>
    %44 = arith.addf %41, %43 : vector<32x128xf32>
    %cst_24 = arith.constant 0.00999999977 : f32
    %45 = vector.broadcast %cst_24 : f32 to vector<32x128xf32>
    %46 = arith.mulf %45, %44 : vector<32x128xf32>
    %47 = arith.maximumf %44, %46 : vector<32x128xf32>
    %48 = arith.truncf %47 : vector<32x128xf32> to vector<32x128xbf16>
    %c0_25 = arith.constant 0 : index
    %c0_26 = arith.constant 0 : index
    %c0_27 = arith.constant 0 : index
    %49 = vector.load %arg8[%c0_25, %c0_26, %c0_27] : memref<1x32x128xbf16, #tpu.memory_space<vmem>>, vector<1x32x128xbf16>
    %50 = vector.shape_cast %49 : vector<1x32x128xbf16> to vector<32x128xbf16>
    %51 = vector.shape_cast %48 : vector<32x128xbf16> to vector<1x32x128xbf16>
    tpu.vector_store %arg8[%c0_25, %c0_26, %c0_27], %51 {strides = array<i32>} : memref<1x32x128xbf16, #tpu.memory_space<vmem>>, vector<1x32x128xbf16>,
    return
  }
  func.func @transform_0(%arg0: i32, %arg1: i32) -> (i32, i32, i32) {
    %c0_i32 = arith.constant 0 : i32
    %c0_i32_0 = arith.constant 0 : i32
    return %arg0, %c0_i32, %arg1 : i32, i32, i32
  }
  func.func @transform_1(%arg0: i32, %arg1: i32) -> (i32, i32) {
    %c0_i32 = arith.constant 0 : i32
    %c0_i32_0 = arith.constant 0 : i32
    %c0_i32_1 = arith.constant 0 : i32
    return %c0_i32, %c0_i32_0 : i32, i32
  }
  func.func @transform_2(%arg0: i32, %arg1: i32) -> (i32, i32) {
    %c0_i32 = arith.constant 0 : i32
    %c0_i32_0 = arith.constant 0 : i32
    %c0_i32_1 = arith.constant 0 : i32
    return %c0_i32, %c0_i32_0 : i32, i32
  }
  func.func @transform_3(%arg0: i32, %arg1: i32) -> (i32, i32) {
    %c0_i32 = arith.constant 0 : i32
    %c0_i32_0 = arith.constant 0 : i32
    %c0_i32_1 = arith.constant 0 : i32
    return %c0_i32, %c0_i32_0 : i32, i32
  }
  func.func @transform_4(%arg0: i32, %arg1: i32) -> (i32, i32) {
    %c0_i32 = arith.constant 0 : i32
    %c0_i32_0 = arith.constant 0 : i32
    %c0_i32_1 = arith.constant 0 : i32
    return %c0_i32, %c0_i32_0 : i32, i32
  }
  func.func @transform_5(%arg0: i32, %arg1: i32) -> (i32, i32) {
    %c0_i32 = arith.constant 0 : i32
    %c0_i32_0 = arith.constant 0 : i32
    %c0_i32_1 = arith.constant 0 : i32
    return %c0_i32, %c0_i32_0 : i32, i32
  }
  func.func @transform_6(%arg0: i32, %arg1: i32) -> (i32, i32, i32) {
    %c0_i32 = arith.constant 0 : i32
    %c0_i32_0 = arith.constant 0 : i32
    return %arg0, %c0_i32, %arg1 : i32, i32, i32
  }
}

</mosaic_0001>

<bundles_post_ra>
// kernel: tpu_custom_call.1
= control target key start
LH: loop header
LB: loop body
LE: loop exit
PB: predicated region body
PF: predicated region fallthrough
CT: control target
= control target key end

     0   :  { %11 = vsyncpa [#allocation4], 0  ;;  %s1565_s0 = inlined_call_operand.vmem [shape: bf16[2,32,256], index: 0, kind: input, shape index: {}]   ;;  %s1566_s1 = inlined_call_operand.vmem [shape: bf16[64,32], index: 1, kind: input, shape index: {}]   ;;  %s1567_s2 = inlined_call_operand.vmem [shape: bf16[16,32], index: 2, kind: input, shape index: {}]   ;;  %s1568_s3 = inlined_call_operand.vmem [shape: bf16[32,16], index: 3, kind: input, shape index: {}]   ;;  %s1569_s4 = inlined_call_operand.vmem [shape: bf16[32,32], index: 4, kind: input, shape index: {}]   ;;  %s1570_s5 = inlined_call_operand.vmem [shape: f32[144,1], index: 5, kind: input, shape index: {}]   ;;  %s1571_s6 = inlined_call_operand.hbm [shape: bf16[2,32,256], index: 6, kind: output, shape index: {}]  }
   0x1   :  { %13 = vsyncpa [#allocation4 + $0x1], 0  ;;  %s1289_s21 = smov 0   ;;  %s1291_s22 = smov 0  }
   0x2   :  { %s1293_s23 = smov 0   ;;  %s1295_s24 = smov 0  }
   0x3   :  { %s1297_s25 = smov 0   ;;  %s1299_s26 = smov 0  }
   0x4   :  { %s1301_s27 = smov 0   ;;  %s1303_s28 = smov 0  }
   0x5 LB: > { %s937_s29 = sadd.s32 4294967295, %s1245_s28   ;;  %s938_s30 = sadd.s32 4294967294, %s1245_s28   ;;  %s1245_s28 = sphi %s1303_s28, %s19_s28   ;;  %s1241_s27 = sphi %s1301_s27, %s1583_s27   ;;  %s1237_s26 = sphi %s1299_s26, %s1582_s26   ;;  %s1233_s25 = sphi %s1297_s25, %s1581_s25   ;;  %s1229_s24 = sphi %s1295_s24, %s1580_s24   ;;  %s1225_s23 = sphi %s1293_s23, %s1579_s23   ;;  %s1221_s22 = sphi %s1291_s22, %s1578_s22   ;;  %s1217_s21 = sphi %s1289_s21, %s1577_s21  }
   0x6   : > { %s28_s7 = sadd.s32 1, %s1237_s26  ;;  %s31_s8 = sadd.s32 1, %s1241_s27 }
   0x7   : > { %p29_p0 = scmp.ge.s32.totalorder %s28_s7, 2  ;;  %p47_p1 = scmp.ne.s32.totalorder %s1225_s23, %s1221_s22 }
   0x8   : > { %p48_p2 = scmp.eq.s32.totalorder %s1245_s28, 0  ;;  %p184_p5 = scmp.eq.s32.totalorder %s937_s29, 3 }
   0x9   : > { %s1585_s7 = smov (%p29_p0, %s28_s7), 0  ;;  %s1587_s8 = smov (!%p29_p0, %s31_s8), %s1241_s27 }
   0xa   : > { %s36_s9 = ssub.s32 %s1237_s26, %s1585_s7  ;;  %p1341_p3 = por %p48_p2, %p47_p1 }
   0xb   : > { %p33_p4 = scmp.ge.s32.totalorder %s1587_s8, 2  ;;  %p189_p6 = scmp.ne.s32.totalorder %s1221_s22, %s1217_s21 }
   0xc   : > { %p190_p7 = scmp.eq.s32.totalorder %s938_s30, 3  ;;  %p1349_p8 = por %p184_p5, %p47_p1 }
   0xd   : > { %s1589_s8 = smov (%p33_p4, %s1587_s8), 0  ;;  %s40_s15 = sadd.s32 1, %s1225_s23 }
   0xe   : > { %p1353_p9 = por %p190_p7, %p189_p6  ;;  %s35_s13 = ssub.s32 %s1241_s27, %s1589_s8 }
   0xf   : > { %s37_s14 = sor.u32 %s36_s9, %s35_s13  ;;  %p940_p11 = scmp.ge.s32.totalorder %s1245_s28, 4 }
  0x10   : > { %p38_p10 = scmp.eq.s32.totalorder %s37_s14, 0 }
  0x11   : > { %221 = sbr.rel (%p940_p11) target bundleno = 30 (0x1e), region = 36 }
  0x12   : > { %s1361_s16 = scalar_select %p38_p10, %s1225_s23, %s40_s15  }
  0x16   : > { %224 = sbr.rel (!%p1341_p3) target bundleno = 30 (0x1e), region = 40  ;;  %s226_s17 = sand.u32 (%p1341_p3), 1, %s1225_s23  }
  0x17   : > { %s942_s18 = sshll.u32 (%p1341_p3), %s1241_s27, 3  ;;  %s941_s19 = sshll.u32 (%p1341_p3), %s226_s17, 4 }
  0x18   : > { %s230_s20 = sadd.s32 (%p1341_p3), %s1237_s26, %s942_s18  ;;  %s228_s14 = scalar_lea.vmem (%p1341_p3), [#allocation2], %s941_s19 }
  0x19   : > { %s943_s29 = sshll.u32 (%p1341_p3), %s230_s20, 2 }
  0x1a   : > { %s232_s13 = scalar_lea.vmem (%p1341_p3), %s1565_s0, %s943_s29 }
  0x1b   : > { %v249_v0 = vld [vmem:[%s232_s13] sm:$0xf]  ;;  %v251_v1 = vld [vmem:[%s232_s13 + $0x8] sm:$0xf]  ;;  %v253_v2 = vld [vmem:[%s232_s13 + $0x10] sm:$0xf] }
  0x1c   : > { %250 = vst [vmem:[%s228_s14] sm:$0xf] %v249_v0  ;;  %252 = vst [vmem:[%s228_s14 + $0x4] sm:$0xf] %v251_v1  ;;  %v255_v3 = vld [vmem:[%s232_s13 + $0x18] sm:$0xf] }
  0x1d   : > { %254 = vst [vmem:[%s228_s14 + $0x8] sm:$0xf] %v253_v2  ;;  %256 = vst [vmem:[%s228_s14 + $0xc] sm:$0xf] %v255_v3 }
  0x1e PF: > { %p944_p12 = scmp.ge.s32.totalorder %s1245_s28, 1  ;;  %p287_p13 = scmp.lt.s32.totalorder %s1245_s28, 5 }
  0x20   : > { %p288_p0 = pnand %p944_p12, %p287_p13 }
  0x21   : > { %s1572_s10 = sand.u32 (!%p288_p0), 1, %s1221_s22   ;;  %s976_s30 = sshll.u32 (!%p288_p0), %s1233_s25, 3 }
  0x22   : > { %291 = sbr.rel (%p288_p0) target bundleno = 945 (0x3b1), region = 81  ;;  %s1380_s18 = sshll.u32 (!%p288_p0), %s1572_s10, 4 }
  0x23   : > { %s296_s19 = scalar_lea.vmem (!%p288_p0), [#allocation2], %s1380_s18  ;;  %s851_s9 = sadd.s32 (!%p288_p0), %s1229_s24, %s976_s30 }
  0x24   : > { %s322_s13 = scalar_lea.vmem (!%p288_p0), [#allocation3], %s1380_s18  ;;  %s977_s15 = sshll.u32 (!%p288_p0), %s851_s9, 6 }
  0x25   : > { %s854_s14 = sshll.u32 (!%p288_p0), %s322_s13, 4  ;;  %s1510_s17 = scalar_lea.hbm (!%p288_p0), %s1571_s6, %s977_s15  ;;  %s1505_s14 = int_to_ptr.vmem [resolvable:$true] %s854_s14 }
  0x26   : > { %s1576_s18 = sand.u32 (!%p288_p0), 1, %s1221_s22   ;;  %s1153_s10 = scalar_lea.vmem (!%p288_p0), %s1505_s14, 256 }
  0x27   : > { %v1126_v4 = vld [vmem:[%s1566_s1] sm:$0xff]   ;;  %vm416_vm0 = vcmask 261120   ;;  %v1384_v5 = vld [vmem:[%s296_s19 + $0x8] sm:$0xff]   ;;  %v1247_v7 = vmov 0   ;;  %v342_v8 = vld [vmem:[%s1570_s5 + $0x30] sm:$0xff]  ;;  %v1248_v29 = vmov 0.0   ;;  %p1154_p1 = scmp.ne.s32.totalorder %s1505_s14, %s1153_s10 }
  0x28   : > { %1015 = vmatprep.mubr.msk.bf16.mxu0 %vm416_vm0, %v1126_v4  ;;  %v1386_v6 = vld [vmem:[%s296_s19] sm:$0xff]   ;;  %1122 = vset.pattern.permute.xlu0 %v1247_v7  ;;  %v343_v10 = vld [vmem:[%s1570_s5 + $0x38] sm:$0xff]  ;;  %v341_v11 = vld [vmem:[%s1570_s5 + $0x28] sm:$0xff]  ;;  %vm1249_vm1 = vmmov 0   ;;  %vm620_vm2 = vcmask 130048   ;;  %s1514_s19 = scalar_lea.sflag [#allocation4], %s1576_s18 }
  0x29   : > { %1123 = vset.pattern.permute.xlu1 %v1247_v7  ;;  %1011 = vmatprep.subr.bf16.mxu0 %v1384_v5  ;;  %v340_v9 = vld [vmem:[%s1570_s5 + $0x20] sm:$0xff]  ;;  %v1127_v12 = vld [vmem:[%s1566_s1 + $0x8] sm:$0xff]   ;;  %v1128_v13 = vld [vmem:[%s1566_s1 + $0x10] sm:$0xff]   ;;  %p1155_p2 = pnand %p1154_p1, %p1349_p8  ;;  %s1250_s20 = smov [#allocation3]  }
  0x2a   : > { %376 = vperm.xlu0 %1122, %v342_v8   ;;  %1012 = vmatpush3.bf16.msra.mxu0 %v1384_v5  ;;  %v516_v14 = vld [vmem:[%s1570_s5 + $0x40] sm:$0xff]  ;;  %v517_v15 = vld [vmem:[%s1570_s5 + $0x48] sm:$0xff]  ;;  %v1129_v18 = vld [vmem:[%s1566_s1 + $0x18] sm:$0xff]   ;;  %s1157_s29 = sshll.u32 %s1250_s20, 4  ;;  %s1158_s29 = int_to_ptr.vmem [resolvable:$false] %s1157_s29 }
  0x2b   : > { %366 = vperm.xlu1 %1123, %v340_v9   ;;  %1013 = vmatprep.subr.bf16.mxu0 %v1386_v6  ;;  %v588_v16 = vld [vmem:[%s1570_s5 + $0x60] sm:$0xff]  ;;  %v589_v17 = vld [vmem:[%s1570_s5 + $0x68] sm:$0xff]  ;;  %v586_v19 = vld [vmem:[%s1570_s5 + $0x50] sm:$0xff]  ;;  %p1156_p3 = pneg %p1155_p2  ;;  %s1159_s30 = scalar_lea.vmem %s1158_s29, 512 }
  0x2c   : > { %v587_v20 = vld [vmem:[%s1570_s5 + $0x58] sm:$0xff]  ;;  %v338_v21 = vld [vmem:[%s1570_s5 + $0x10] sm:$0xff]  ;;  %v336_v23 = vld [vmem:[%s1570_s5] sm:$0xff]  ;;  %1023 = vmatprep.subr.bf16.mxu1 %v1248_v29  ;;  %1027 = vmatprep.mubr.msk.bf16.mxu1 %vm1249_vm1, %v1248_v29  ;;  %p1160_p4 = scmp.lt.s32.totalorder %s1505_s14, %s1158_s29  ;;  %p1161_p5 = scmp.lt.s32.totalorder %s1159_s30, %s1153_s10 }
  0x2d   : > { %v339_v22 = vld [vmem:[%s1570_s5 + $0x18] sm:$0xff]  ;;  %v337_v24 = vld [vmem:[%s1570_s5 + $0x8] sm:$0xff]  ;;  %v722_v25 = vld [vmem:[%s1570_s5 + $0x70] sm:$0xff] }
  0x2e   : > { %381 = vperm.xlu0 %1122, %v343_v10   ;;  %1014 = vmatpush3.bf16.msra.mxu0 %v1386_v6  ;;  %v723_v26 = vld [vmem:[%s1570_s5 + $0x78] sm:$0xff]  ;;  %v724_v27 = vld [vmem:[%s1570_s5 + $0x80] sm:$0xff]  ;;  %v725_v28 = vld [vmem:[%s1570_s5 + $0x88] sm:$0xff]  ;;  %p1162_p6 = por %p1161_p5, %p1160_p4 }
  0x2f   : > { %371 = vperm.xlu1 %1123, %v341_v11  }
  0x30   : > { %p1163_p7 = pnand %p1162_p6, %p1156_p3 }
  0x31   : > { %1016 = vmatmul.mubr.msk.bf16.vlgmr.msra.gmra.mxu0 %vm416_vm0, %v1127_v12 }
  0x32   : > { %520 = vperm.xlu0 %1122, %v516_v14   ;;  %1019 = vmatprep.mubr.msk.bf16.mxu0 %vm416_vm0, %v1128_v13 }
  0x33   : > { %525 = vperm.xlu1 %1123, %v517_v15  }
  0x36   : > { %602 = vperm.xlu0 %1122, %v588_v16  }
  0x37   : > { %607 = vperm.xlu1 %1123, %v589_v17  }
  0x39   : > { %1020 = vmatmul.mubr.msk.bf16.gmra.mxu0 %vm416_vm0, %v1129_v18  ;;  %v1130_v18 = vld [vmem:[%s1567_s2] sm:$0xff]  }
  0x3a   : > { %592 = vperm.xlu0 %1122, %v586_v19   ;;  %v1131_v19 = vld [vmem:[%s1568_s3] sm:$0xff]  }
  0x3b   : > { %597 = vperm.xlu1 %1123, %v587_v20  }
  0x3e   : > { %356 = vperm.xlu0 %1122, %v338_v21  }
  0x3f   : > { %361 = vperm.xlu1 %1123, %v339_v22  }
  0x42   : > { %346 = vperm.xlu0 %1122, %v336_v23  }
  0x43   : > { %351 = vperm.xlu1 %1123, %v337_v24  }
  0x46   : > { %728 = vperm.xlu0 %1122, %v722_v25  }
  0x47   : > { %733 = vperm.xlu1 %1123, %v723_v26  }
  0x4a   : > { %738 = vperm.xlu0 %1122, %v724_v27  }
  0x4b   : > { %743 = vperm.xlu1 %1123, %v725_v28  }
  0xa5   : > { %v377_v30 = vpop.permute.xlu0 %376 }
  0xa6   : > { %v367_v31 = vpop.permute.xlu1 %366 }
  0xa9   : > { %v382_v32 = vpop.permute.xlu0 %381 }
  0xaa   : > { %v372_v33 = vpop.permute.xlu1 %371 }
  0xad   : > { %v521_v34 = vpop.permute.xlu0 %520 }
  0xae   : > { %v526_v35 = vpop.permute.xlu1 %525 }
  0xb1   : > { %v1458_v36 = vpop.permute.xlu0 %602 }
  0xb2   : > { %v1460_v37 = vpop.permute.xlu1 %607 }
  0xb5   : > { %v1462_v38 = vpop.permute.xlu0 %592 }
  0xb6   : > { %v1464_v39 = vpop.permute.xlu1 %597 }
  0xb9   : > { %v357_v40 = vpop.permute.xlu0 %356 }
  0xba   : > { %v362_v41 = vpop.permute.xlu1 %361 }
  0xbd   : > { %v347_v44 = vpop.permute.xlu0 %346 }
  0xbe   : > { %v352_v50 = vpop.permute.xlu1 %351 }
  0xf1   : > { %v1017_v42 = vpop.f32.mrf.mxu0 }
  0xf2   : > { %v472_v43 = vadd.f32 %v1017_v42, %v357_v40 }
  0xf3   : > { %v463_v45 = vpop.f32.mrf.mxu0 }
  0xf4   : > { %v464_v46 = vadd.f32 %v463_v45, %v347_v44  ;;  %v496_v48 = vmul.f32 0.01, %v472_v43 }
  0xf5   : > { %v1018_v47 = vpop.f32.mrf.mxu0 }
  0xf6   : > { %v475_v49 = vadd.f32 %v1018_v47, %v362_v41  ;;  %v494_v52 = vmul.f32 0.01, %v464_v46  ;;  %v504_v56 = vmax.f32 %v472_v43, %v496_v48 }
  0xf7   : > { %v466_v51 = vpop.f32.mrf.mxu0 }
  0xf8   : > { %v497_v53 = vmul.f32 0.01, %v475_v49  ;;  %v467_v54 = vadd.f32 %v466_v51, %v352_v50  ;;  %v502_v61 = vmax.f32 %v464_v46, %v494_v52 }
  0xf9   : > { %v1021_v55 = vpop.f32.mrf.mxu0 }
  0xfa   : > { %v505_v57 = vmax.f32 %v475_v49, %v497_v53  ;;  %v495_v58 = vmul.f32 0.01, %v467_v54  ;;  %v488_v59 = vadd.f32 %v1021_v55, %v377_v30 }
  0xfb   : > { %v479_v60 = vpop.f32.mrf.mxu0 }
  0xfc   : > { %v1466_v62 = vpack.c.bf16 %v505_v57, %v504_v56  ;;  %v503_v63 = vmax.f32 %v467_v54, %v495_v58  ;;  %v500_v2 = vmul.f32 0.01, %v488_v59  ;;  %v480_v3 = vadd.f32 %v479_v60, %v367_v31  ;;  %v1132_v31 = vld [vmem:[%s1568_s3 + $0x8] sm:$0xff]  }
  0xfd   : > { %v1022_v0 = vpop.f32.mrf.mxu0  ;;  %v708_v56 = vunpack.c.l.bf16 %v1386_v6  ;;  %v711_v60 = vunpack.c.h.bf16 %v1384_v5 }
  0xfe   : > { %v1468_v1 = vpack.c.bf16 %v503_v63, %v502_v61  ;;  %v491_v4 = vadd.f32 %v1022_v0, %v382_v32  ;;  %v508_v11 = vmax.f32 %v488_v59, %v500_v2  ;;  %v498_v12 = vmul.f32 0.01, %v480_v3  ;;  %v1133_v32 = vld [vmem:[%s1569_s4] sm:$0xff]  }
  0xff   : > { %v482_v7 = vpop.f32.mrf.mxu0  ;;  %1041 = vmatprep.mubr.msk.bf16.mxu0 %vm416_vm0, %v1133_v32  ;;  %v702_v55 = vunpack.c.l.bf16 %v1466_v62  ;;  %v703_v61 = vunpack.c.h.bf16 %v1466_v62  ;;  %v734_v62 = vpop.permute.xlu1 %733 }
 0x100   : > { %v483_v8 = vadd.f32 %v482_v7, %v372_v33  ;;  %v501_v9 = vmul.f32 0.01, %v491_v4  ;;  %v506_v16 = vmax.f32 %v480_v3, %v498_v12  ;;  %v700_v57 = vunpack.c.l.bf16 %v1468_v1 }
 0x101   : > { %v709_v3 = vunpack.c.h.bf16 %v1386_v6  ;;  %v729_v6 = vpop.permute.xlu0 %728 }
 0x102   : > { %v499_v10 = vmul.f32 0.01, %v483_v8  ;;  %v509_v13 = vmax.f32 %v491_v4, %v501_v9  ;;  %v701_v4 = vunpack.c.h.bf16 %v1468_v1 }
 0x104   : > { %v507_v14 = vmax.f32 %v483_v8, %v499_v10  ;;  %v513_v15 = vpack.c.bf16 %v509_v13, %v508_v11 }
 0x105   : > { %v739_v1 = vpop.permute.xlu0 %738 }
 0x106   : > { %1024 = vmatpush3.bf16.msra.mxu1 %v513_v15  ;;  %v512_v17 = vpack.c.bf16 %v507_v14, %v506_v16 }
 0x107   : > { %1025 = vmatprep.subr.bf16.mxu1 %v1248_v29 }
 0x10a   : > { %1026 = vmatpush3.bf16.msra.mxu1 %v512_v17 }
 0x10d   : > { %1028 = vmatmul.mubr.msk.bf16.vlgmr.msra.gmra.mxu1 %vm416_vm0, %v1130_v18 }
 0x10e   : > { %1033 = vmatprep.mubr.msk.bf16.mxu1 %vm620_vm2, %v1131_v19  ;;  %v744_v19 = vpop.permute.xlu1 %743 }
 0x1cd   : > { %v570_v20 = vpop.f32.mrf.mxu1 }
 0x1ce   : > { %v571_v21 = vadd.f32 %v570_v20, %v521_v34 }
 0x1cf   : > { %v1029_v22 = vpop.f32.mrf.mxu1 }
 0x1d0   : > { %v577_v24 = vmul.f32 0.01, %v571_v21 }
 0x1d1   : > { %v573_v23 = vpop.f32.mrf.mxu1 }
 0x1d2   : > { %v574_v25 = vadd.f32 %v573_v23, %v526_v35  ;;  %v579_v28 = vmax.f32 %v571_v21, %v577_v24 }
 0x1d3   : > { %v1030_v26 = vpop.f32.mrf.mxu1 }
 0x1d4   : > { %v578_v27 = vmul.f32 0.01, %v574_v25 }
 0x1d6   : > { %v580_v29 = vmax.f32 %v574_v25, %v578_v27 }
 0x1d8   : > { %v581_v30 = vpack.c.bf16 %v580_v29, %v579_v28 }
 0x1da   : > { %1031 = vmatprep.subr.bf16.mxu1 %v581_v30 }
 0x1db   : > { %1032 = vmatpush3.bf16.msra.mxu1 %v581_v30 }
 0x1de   : > { %1034 = vmatmul.mubr.msk.bf16.vlgmr.msra.gmra.mxu1 %vm620_vm2, %v1132_v31 }
 0x29e   : > { %v1035_v33 = vpop.f32.mrf.mxu1 }
 0x29f   : > { %v670_v34 = vadd.f32 %v1035_v33, %v1458_v36 }
 0x2a0   : > { %v661_v35 = vpop.f32.mrf.mxu1 }
 0x2a1   : > { %v965_v40 = vmul.f32 -1.442695, %v670_v34  ;;  %v662_v41 = vadd.f32 %v661_v35, %v1462_v38 }
 0x2a2   : > { %v1036_v42 = vpop.f32.mrf.mxu1 }
 0x2a3   : > { %1137 = vpow2.f32 %v965_v40  ;;  %v963_v43 = vmul.f32 -1.442695, %v662_v41  ;;  %v673_v44 = vadd.f32 %v1036_v42, %v1460_v37  ;;  %v710_v37 = vunpack.c.l.bf16 %v1384_v5  ;;  %v1134_v5 = vld [vmem:[%s1569_s4 + $0x8] sm:$0xff]  }
 0x2a4   : > { %v664_v45 = vpop.f32.mrf.mxu1 }
 0x2a5   : > { %1139 = vpow2.f32 %v963_v43  ;;  %v966_v46 = vmul.f32 -1.442695, %v673_v44  ;;  %v665_v47 = vadd.f32 %v664_v45, %v1464_v39 }
 0x2a7   : > { %1141 = vpow2.f32 %v966_v46  ;;  %v964_v48 = vmul.f32 -1.442695, %v665_v47 }
 0x2a9   : > { %1143 = vpow2.f32 %v964_v48 }
 0x2b0   : > { %v1138_v49 = vpop.eup %1137 }
 0x2b1   : > { %v690_v50 = vadd.f32 1.0, %v1138_v49 }
 0x2b2   : > { %v1140_v36 = vpop.eup %1139 }
 0x2b3   : > { %1145 = vrcp.f32 %v690_v50  ;;  %v688_v51 = vadd.f32 1.0, %v1140_v36 }
 0x2b4   : > { %v1142_v52 = vpop.eup %1141 }
 0x2b5   : > { %1147 = vrcp.f32 %v688_v51  ;;  %v691_v38 = vadd.f32 1.0, %v1142_v52 }
 0x2b6   : > { %v1144_v53 = vpop.eup %1143 }
 0x2b7   : > { %1149 = vrcp.f32 %v691_v38  ;;  %v689_v54 = vadd.f32 1.0, %v1144_v53 }
 0x2b9   : > { %1151 = vrcp.f32 %v689_v54 }
 0x2c0   : > { %v1146_v39 = vpop.eup %1145 }
 0x2c1   : > { %v706_v58 = vmul.f32 %v1146_v39, %v702_v55 }
 0x2c2   : > { %v1148_v59 = vpop.eup %1147 }
 0x2c3   : > { %v714_v63 = vadd.f32 %v710_v37, %v706_v58  ;;  %v704_v0 = vmul.f32 %v1148_v59, %v700_v57 }
 0x2c4   : > { %v1150_v2 = vpop.eup %1149 }
 0x2c5   : > { %v707_v7 = vmul.f32 %v1150_v2, %v703_v61  ;;  %v712_v8 = vadd.f32 %v708_v56, %v704_v0 }
 0x2c6   : > { %v1152_v9 = vpop.eup %1151 }
 0x2c7   : > { %v715_v10 = vadd.f32 %v711_v60, %v707_v7  ;;  %v705_v11 = vmul.f32 %v1152_v9, %v701_v4 }
 0x2c9   : > { %v717_v12 = vpack.c.bf16 %v715_v10, %v714_v63  ;;  %v713_v13 = vadd.f32 %v709_v3, %v705_v11 }
 0x2cb   : > { %1037 = vmatprep.subr.bf16.mxu0 %v717_v12  ;;  %v716_v14 = vpack.c.bf16 %v713_v13, %v712_v8 }
 0x2cc   : > { %1038 = vmatpush3.bf16.msra.mxu0 %v717_v12 }
 0x2cd   : > { %1039 = vmatprep.subr.bf16.mxu0 %v716_v14 }
 0x2d0   : > { %1040 = vmatpush3.bf16.msra.mxu0 %v716_v14 }
 0x2d3   : > { %1042 = vmatmul.mubr.msk.bf16.vlgmr.msra.gmra.mxu0 %vm416_vm0, %v1134_v5 }
 0x393   : > { %v1043_v15 = vpop.f32.mrf.mxu0 }
 0x394   : > { %v805_v16 = vadd.f32 %v1043_v15, %v739_v1 }
 0x395   : > { %v796_v17 = vpop.f32.mrf.mxu0 }
 0x396   : > { %v797_v18 = vadd.f32 %v796_v17, %v729_v6  ;;  %v813_v21 = vmul.f32 0.01, %v805_v16 }
 0x397   : > { %v1044_v20 = vpop.f32.mrf.mxu0 }
 0x398   : > { %v808_v22 = vadd.f32 %v1044_v20, %v744_v19  ;;  %v811_v24 = vmul.f32 0.01, %v797_v18  ;;  %v817_v27 = vmax.f32 %v805_v16, %v813_v21 }
 0x399   : > { %v799_v23 = vpop.f32.mrf.mxu0 }
 0x39a   : > { %v814_v25 = vmul.f32 0.01, %v808_v22  ;;  %v800_v26 = vadd.f32 %v799_v23, %v734_v62  ;;  %v815_v30 = vmax.f32 %v797_v18, %v811_v24 }
 0x39c   : > { %v818_v28 = vmax.f32 %v808_v22, %v814_v25  ;;  %v812_v29 = vmul.f32 0.01, %v800_v26 }
 0x39e   : > { %v992_v31 = vpack.c.bf16 %v818_v28, %v817_v27  ;;  %v816_v32 = vmax.f32 %v800_v26, %v812_v29 }
 0x3a0   : > { %994 = vst [vmem:[%s322_s13 + $0x8] sm:$0xff] %v992_v31   ;;  %v987_v33 = vpack.c.bf16 %v816_v32, %v815_v30 }
 0x3a2   : > { %988 = vst [vmem:[%s322_s13] sm:$0xff] %v987_v33  }
 0x3a3   : > { %1166 = shalt.err (!%p1163_p7)
}
 0x3a4   : > { %s1167_s9 = scalar_lea.hbm %s1510_s17, 256  ;;  %s1171_s24 = scalar_lea.hbm %s1571_s6, 1024 }
 0x3a5   : > { %p1168_p10 = scmp.ne.s32.totalorder %s1510_s17, %s1167_s9  ;;  %p1172_p13 = scmp.lt.s32.totalorder %s1510_s17, %s1571_s6 }
 0x3a6   : > { %p1173_p0 = scmp.lt.s32.totalorder %s1171_s24, %s1167_s9 }
 0x3a7   : > { %p1169_p11 = pnand %p1168_p10, %p1349_p8 }
 0x3a8   : > { %p1174_p1 = por %p1173_p0, %p1172_p13 }
 0x3a9   : > { %p1170_p12 = pneg %p1169_p11 }
 0x3ab   : > { %p1175_p2 = pnand %p1174_p1, %p1170_p12 }
 0x3ad   : > { %1178 = shalt.err (!%p1175_p2)
}
 0x3ae   : > { %s1251_s10 = smov 64   ;;  %s1252_s20 = smov 128  }
 0x3af   : > { %s1253_s29 = smov 4  }
 0x3b0   : > { %1045 = dma.vmem_to_hbm [thread:$0]  (%p1349_p8), %s1505_s14, 256, %s1510_s17, %s1514_s19, %s1251_s10, %s1252_s20, %s1253_s29  }
 0x3b1 PF: > { %p1051_p3 = scmp.ge.s32.totalorder %s1245_s28, 2  ;;  %s869_s30 = sand.u32 1, %s1217_s21  }
 0x3b2   : > { %s870_s9 = scalar_lea.sflag [#allocation4], %s869_s30 }
 0x3b3   : > { %p1048_p4 = pnand %p1051_p3, %p1353_p9 }
 0x3b5   : > { %p1049_p5 = pneg %p1048_p4 }
 0x3b7   : > { %1212 = dma.done.wait (%p1049_p5), %s870_s9, 256  }
 0x3b8   : > { %1214 = vsyncadd (%p1049_p5), %s870_s9, 4294967040  ;;  %s19_s28 = sadd.s32 1, %s1245_s28   ;;  %s1577_s21 = smov %s1221_s22 }
 0x3b9   : > { %p16_p6 = scmp.ge.s32.totalorder %s19_s28, 6   ;;  %s1578_s22 = smov %s1225_s23 }
 0x3ba   : > { %s1579_s23 = smov %s1361_s16  ;;  %s1580_s24 = smov %s1237_s26 }
 0x3bb   : > { %s1581_s25 = smov %s1241_s27  ;;  %s1582_s26 = smov %s1585_s7 }
 0x3bc   : > { %s1583_s27 = smov %s1589_s8  ;;  %18 = sbr.rel (!%p16_p6) target bundleno = 5 (0x5), region = 125 }
 0x3c1   :  { %875 = vsyncpa [#allocation4], 1 }
 0x3c2   :  { %877 = vsyncpa [#allocation4 + $0x1], 1 }

</bundles_post_ra>
